<compile_context>
chip_gen: v7x
topology: tpu7x:2x2x1
jax: 0.10.0
libtpu: 0.0.40
codegen_flags: <defaults>
</compile_context>

<pallas_src>
import functools

import jax
import jax.numpy as jnp
from jax.experimental import pallas as pl
from jax.experimental.pallas import tpu as pltpu


def center_loss_kernel(labels_ref, feats_ref, centers_ref, out_ref, acc_ref,
                       *, tb, n_per_core, num_classes, batch, mask_rows):
    """One grid step handles a (tb, D) tile of the batch on one core."""
    c = pl.program_id(0)          # "parallel" (core) axis
    j = pl.program_id(1)          # "arbitrary" (reduction over batch tiles)

    # Per-core resident accumulator: init on the first reduction step.
    @pl.when(j == 0)
    def _init():
        acc_ref[...] = jnp.zeros_like(acc_ref)

    feats = feats_ref[...].astype(jnp.float32)            # (tb, D)
    labels = labels_ref[...]                              # (tb, 1) int32

    # Row gather of the VMEM-resident centers via one-hot matmul on the MXU.
    # (Out-of-range labels produce an all-zero one-hot row; the PyTorch
    #  reference would raise an index error for those, so this is benign.)
    class_ids = jax.lax.broadcasted_iota(jnp.int32, (tb, num_classes), 1)
    onehot = (labels == class_ids).astype(jnp.float32)    # (tb, C)
    batch_centers = jnp.dot(onehot, centers_ref[...].astype(jnp.float32),
                            preferred_element_type=jnp.float32)   # (tb, D)

    diff = feats - batch_centers
    sq = diff * diff

    if mask_rows:
        # Only needed when the batch was padded up to the tile layout.
        tile_start = (c * n_per_core + j) * tb
        row_ids = tile_start + jax.lax.broadcasted_iota(jnp.int32, (tb, 1), 0)
        sq = jnp.where(row_ids < batch, sq, 0.0)

    # Sublane reduce per step; keep lane-dense (1, D) partials in f32.
    acc_ref[...] += jnp.sum(sq, axis=0, keepdims=True)

    # Write the per-core partial out exactly once, on the last reduction step.
    @pl.when(j == n_per_core - 1)
    def _finalize():
        out_ref[...] = acc_ref[...].reshape(out_ref.shape)


def center_loss(features, labels, centers):
    """features: (B, D), labels: (B,) int, centers: (C, D) -> scalar loss."""
    B, D = features.shape
    C, D2 = centers.shape
    assert D == D2

    feat_itemsize = jnp.dtype(features.dtype).itemsize
    centers_itemsize = jnp.dtype(centers.dtype).itemsize

    # --- batch tile: target ~2 MiB per feature buffer, multiple of 8 --------
    target_bytes = 2 * 1024 * 1024
    tb = (target_bytes // max(1, D * feat_itemsize)) // 8 * 8
    tb = max(8, min(1024, tb))
    tb = min(tb, pl.cdiv(B, 8) * 8)            # never bigger than the batch

    n_tiles_total = pl.cdiv(B, tb)
    n_cores = 2 if n_tiles_total >= 2 else 1   # megacore split on v7x
    n_per_core = pl.cdiv(n_tiles_total, n_cores)
    B_pad = n_cores * n_per_core * tb
    mask_rows = (B_pad != B)

    labels_col = labels.astype(jnp.int32).reshape(B, 1)
    if mask_rows:
        feats_in = jnp.zeros((B_pad, D), features.dtype).at[:B].set(features)
        labels_in = jnp.zeros((B_pad, 1), jnp.int32).at[:B].set(labels_col)
    else:
        feats_in = features
        labels_in = labels_col

    # --- explicit VMEM budget (works on v5e 16 MiB scoped .. v7x 64 MiB) ----
    lane = 128
    d_pad = pl.cdiv(D, lane) * lane
    vmem_needed = (
        2 * tb * D * feat_itemsize                       # feature double buffer
        + 2 * tb * lane * 4                              # labels (lane-padded)
        + 2 * pl.cdiv(C, 8) * 8 * d_pad * centers_itemsize   # resident centers
        + 2 * 8 * d_pad * 4                              # output blocks
        + 8 * d_pad * 4                                  # accumulator scratch
    )
    vmem_limit = int(min(48 * 1024 * 1024,
                         max(16 * 1024 * 1024, 2 * vmem_needed)))

    kernel = functools.partial(
        center_loss_kernel, tb=tb, n_per_core=n_per_core,
        num_classes=C, batch=B, mask_rows=mask_rows)

    out = pl.pallas_call(
        kernel,
        out_shape=jax.ShapeDtypeStruct((n_cores, 1, D), jnp.float32),
        grid_spec=pltpu.PrefetchScalarGridSpec(
            num_scalar_prefetch=0,
            grid=(n_cores, n_per_core),
            in_specs=[
                # labels column, tiled over the batch
                pl.BlockSpec((tb, 1), lambda c, j: (c * n_per_core + j, 0)),
                # features tile, auto double-buffered
                pl.BlockSpec((tb, D), lambda c, j: (c * n_per_core + j, 0)),
                # centers: constant index map -> resident in VMEM, one HBM read
                pl.BlockSpec((C, D), lambda c, j: (0, 0)),
            ],
            # one partial block per core (no shared accumulator across cores)
            out_specs=pl.BlockSpec((1, 1, D), lambda c, j: (c, 0, 0)),
            scratch_shapes=[pltpu.VMEM((1, D), jnp.float32)],
        ),
        compiler_params=pltpu.CompilerParams(
            dimension_semantics=("parallel", "arbitrary"),
            vmem_limit_bytes=vmem_limit,
        ),
        cost_estimate=pl.CostEstimate(
            flops=2 * B_pad * C * D + 3 * B_pad * D,
            transcendentals=0,
            bytes_accessed=(B_pad * D * feat_itemsize
                            + C * D * centers_itemsize
                            + B_pad * 4 + n_cores * D * 4),
        ),
    )(labels_in, feats_in, centers)

    # Tiny epilogue in XLA: cross-core + cross-lane reduce and the 0.5/B scale.
    return 0.5 * jnp.sum(out) / B


if __name__ == "__main__":
    # Small, deterministic shapes: batch=8, num_classes=10, feat_dim=32.
    key = jax.random.PRNGKey(0)
    k_feat, k_centers, k_labels = jax.random.split(key, 3)

    B, C, D = 8, 10, 32
    features = jax.random.normal(k_feat, (B, D), dtype=jnp.float32)
    # Deterministic "parameter" init, mirroring torch.randn(num_classes, feat_dim).
    centers = jax.random.normal(k_centers, (C, D), dtype=jnp.float32)
    labels = jax.random.randint(k_labels, (B,), 0, C, dtype=jnp.int32)

    loss = jax.block_until_ready(center_loss(features, labels, centers))

    # Pure-JAX reference for sanity.
    ref = 0.5 * jnp.sum((features - centers[labels]) ** 2) / B
    assert jnp.allclose(loss, ref, rtol=1e-5, atol=1e-5), (loss, ref)

    print("KERNEL_OK")
</pallas_src>

<mosaic_0001>
module attributes {stable_mosaic.version = 11 : i64} {
  func.func @center_loss_kernel(%arg0: i32, %arg1: i32, %arg2: memref<8x1xi32, #tpu.memory_space<vmem>>, %arg3: memref<8x32xf32, #tpu.memory_space<vmem>>, %arg4: memref<10x32xf32, #tpu.memory_space<vmem>>, %arg5: memref<1x1x32xf32, #tpu.memory_space<vmem>>, %arg6: memref<1x32xf32, #tpu.memory_space<vmem>>) attributes {dimension_semantics = [#tpu.dimension_semantics<parallel>, #tpu.dimension_semantics<arbitrary>], iteration_bounds = array<i64: 1, 1>, scalar_prefetch = 0 : i64, scratch_operands = 1 : i64, tpu.core_type = #tpu.core_type<tc>, window_params = [{transform_indices = @transform_0, window_bounds = array<i64: 8, 1>}, {transform_indices = @transform_1, window_bounds = array<i64: 8, 32>}, {pipeline_mode = #tpu.pipeline_mode<synchronous>, transform_indices = @transform_2, window_bounds = array<i64: 10, 32>}, {transform_indices = @transform_3, window_bounds = array<i64: 1, 1, 32>}]} {
    %c0_i32 = arith.constant 0 : i32
    %0 = arith.cmpi eq, %arg1, %c0_i32 : i32
    %1 = arith.extui %0 : i1 to i32
    %c0_i32_0 = arith.constant 0 : i32
    %2 = arith.cmpi ne, %1, %c0_i32_0 : i32
    scf.if %2 {
      %cst_13 = arith.constant 0.000000e+00 : f32
      %22 = vector.broadcast %cst_13 : f32 to vector<1x32xf32>
      %c0_14 = arith.constant 0 : index
      %c0_15 = arith.constant 0 : index
      %23 = vector.load %arg6[%c0_14, %c0_15] : memref<1x32xf32, #tpu.memory_space<vmem>>, vector<1x32xf32>
      tpu.vector_store %arg6[%c0_14, %c0_15], %22 {strides = array<i32>} : memref<1x32xf32, #tpu.memory_space<vmem>>, vector<1x32xf32>,
    } else {
    }
    %c0 = arith.constant 0 : index
    %c0_1 = arith.constant 0 : index
    %3 = vector.load %arg3[%c0, %c0_1] : memref<8x32xf32, #tpu.memory_space<vmem>>, vector<8x32xf32>
    %c0_2 = arith.constant 0 : index
    %c0_3 = arith.constant 0 : index
    %4 = vector.load %arg2[%c0_2, %c0_3] : memref<8x1xi32, #tpu.memory_space<vmem>>, vector<8x1xi32>
    %5 = tpu.iota {dimensions = array<i32: 1>} : vector<8x10xi32>
    %6 = vector.broadcast %4 : vector<8x1xi32> to vector<8x10xi32>
    %7 = arith.cmpi eq, %6, %5 : vector<8x10xi32>
    %8 = arith.extui %7 : vector<8x10xi1> to vector<8x10xi32>
    %9 = arith.sitofp %8 : vector<8x10xi32> to vector<8x10xf32>
    %c0_4 = arith.constant 0 : index
    %c0_5 = arith.constant 0 : index
    %10 = vector.load %arg4[%c0_4, %c0_5] : memref<10x32xf32, #tpu.memory_space<vmem>>, vector<10x32xf32>
    %cst = arith.constant dense<0.000000e+00> : vector<8x32xf32>
    %11 = tpu.matmul %9, %10, %cst {dimension_numbers = #tpu.dot_dimension_numbers<[1], [0], [0], [1], [0, 0, 1, 1], [], []>} : vector<8x10xf32>, vector<10x32xf32>, vector<8x32xf32> -> vector<8x32xf32>
    %12 = arith.subf %3, %11 : vector<8x32xf32>
    %13 = arith.mulf %12, %12 : vector<8x32xf32>
    %c0_6 = arith.constant 0 : index
    %c0_7 = arith.constant 0 : index
    %14 = vector.load %arg6[%c0_6, %c0_7] : memref<1x32xf32, #tpu.memory_space<vmem>>, vector<1x32xf32>
    %cst_8 = arith.constant dense<0.000000e+00> : vector<32xf32>
    %15 = vector.multi_reduction <add>, %13, %cst_8 [0] : vector<8x32xf32> to vector<32xf32>
    %16 = vector.shape_cast %15 : vector<32xf32> to vector<1x32xf32>
    %17 = arith.addf %14, %16 : vector<1x32xf32>
    %c0_9 = arith.constant 0 : index
    %c0_10 = arith.constant 0 : index
    %18 = vector.load %arg6[%c0_9, %c0_10] : memref<1x32xf32, #tpu.memory_space<vmem>>, vector<1x32xf32>
    tpu.vector_store %arg6[%c0_9, %c0_10], %17 {strides = array<i32>} : memref<1x32xf32, #tpu.memory_space<vmem>>, vector<1x32xf32>,
    %c0_i32_11 = arith.constant 0 : i32
    %19 = arith.cmpi eq, %arg1, %c0_i32_11 : i32
    %20 = arith.extui %19 : i1 to i32
    %c0_i32_12 = arith.constant 0 : i32
    %21 = arith.cmpi ne, %20, %c0_i32_12 : i32
    scf.if %21 {
      %c0_13 = arith.constant 0 : index
      %c0_14 = arith.constant 0 : index
      %22 = vector.load %arg6[%c0_13, %c0_14] : memref<1x32xf32, #tpu.memory_space<vmem>>, vector<1x32xf32>
      %23 = vector.shape_cast %22 : vector<1x32xf32> to vector<1x1x32xf32>
      %c0_15 = arith.constant 0 : index
      %c0_16 = arith.constant 0 : index
      %c0_17 = arith.constant 0 : index
      %24 = vector.load %arg5[%c0_15, %c0_16, %c0_17] : memref<1x1x32xf32, #tpu.memory_space<vmem>>, vector<1x1x32xf32>
      tpu.vector_store %arg5[%c0_15, %c0_16, %c0_17], %23 {strides = array<i32>} : memref<1x1x32xf32, #tpu.memory_space<vmem>>, vector<1x1x32xf32>,
    } else {
    }
    return
  }
  func.func @transform_0(%arg0: i32, %arg1: i32) -> (i32, i32) {
    %c1_i32 = arith.constant 1 : i32
    %0 = arith.muli %arg0, %c1_i32 : i32
    %1 = arith.addi %0, %arg1 : i32
    %c0_i32 = arith.constant 0 : i32
    %c0_i32_0 = arith.constant 0 : i32
    return %1, %c0_i32 : i32, i32
  }
  func.func @transform_1(%arg0: i32, %arg1: i32) -> (i32, i32) {
    %c1_i32 = arith.constant 1 : i32
    %0 = arith.muli %arg0, %c1_i32 : i32
    %1 = arith.addi %0, %arg1 : i32
    %c0_i32 = arith.constant 0 : i32
    %c0_i32_0 = arith.constant 0 : i32
    return %1, %c0_i32 : i32, i32
  }
  func.func @transform_2(%arg0: i32, %arg1: i32) -> (i32, i32) {
    %c0_i32 = arith.constant 0 : i32
    %c0_i32_0 = arith.constant 0 : i32
    %c0_i32_1 = arith.constant 0 : i32
    return %c0_i32, %c0_i32_0 : i32, i32
  }
  func.func @transform_3(%arg0: i32, %arg1: i32) -> (i32, i32, i32) {
    %c0_i32 = arith.constant 0 : i32
    %c0_i32_0 = arith.constant 0 : i32
    %c0_i32_1 = arith.constant 0 : i32
    return %arg0, %c0_i32, %c0_i32_0 : i32, i32, i32
  }
}

</mosaic_0001>

<bundles_post_ra>
// kernel: tpu_custom_call.1
= control target key start
LH: loop header
LB: loop body
LE: loop exit
PB: predicated region body
PF: predicated region fallthrough
CT: control target
= control target key end

     0   :  { %8 = vsyncpa [#allocation4], 0  ;;  %s320_s0 = inlined_call_operand.vmem [shape: s32[8,1], index: 0, kind: input, shape index: {}]   ;;  %s321_s1 = inlined_call_operand.hbm [shape: f32[8,32], index: 1, kind: input, shape index: {}]   ;;  %s322_s2 = inlined_call_operand.vmem [shape: f32[10,32], index: 2, kind: input, shape index: {}]   ;;  %s323_s3 = inlined_call_operand.hbm [shape: f32[1,1,32], index: 3, kind: output, shape index: {}]  }
   0x1   :  { %9 = vsyncpa [#allocation5], 0  ;;  %s257_s12 = smov [#allocation3]   ;;  %s209_s16 = scalar_lea.hbm %s321_s1, 128 }
   0x2   :  { %s27_s13 = sshll.u32 %s257_s12, 4  ;;  %p210_p0 = scmp.ne.s32.totalorder %s321_s1, %s209_s16  ;;  %s28_s13 = int_to_ptr.vmem [resolvable:$true] %s27_s13 }
   0x3   :  { %p213_p1 = scmp.lt.u32.totalorder %s209_s16, %s321_s1 }
   0x5   :  { %p215_p2 = pnand %p213_p1, %p210_p0 }
   0x7   :  { %218 = shalt.err (!%p215_p2)
}
   0x8   :  { %s219_s21 = scalar_lea.vmem %s28_s13, 128  ;;  %p224_p4 = scmp.lt.s32.totalorder %s28_s13, %s28_s13 }
   0x9   :  { %p220_p3 = scmp.ne.s32.totalorder %s28_s13, %s219_s21  ;;  %p225_p5 = scmp.lt.s32.totalorder %s219_s21, %s219_s21 }
   0xb   :  { %p226_p6 = por %p225_p5, %p224_p4 }
   0xd   :  { %p227_p7 = pnand %p226_p6, %p220_p3 }
   0xf   :  { %230 = shalt.err (!%p227_p7)
}
  0x10   :  { %30 = dma.hbm_to_vmem [thread:$0]  %s321_s1, 128, %s28_s13, [#allocation4]  }
  0x11   :  { %253 = dma.done.wait [#allocation4], 128  }
  0x12   :  { %254 = vsyncadd [#allocation4], 4294967168  ;;  %v258_v0 = vmov 0   ;;  %v259_v1 = vmov 0.0|0.0   ;;  %vm70_vm0 = vcmask 1041408   ;;  %vm260_vm1 = vmmov 1  }
  0x13   :  { %208 = vset.pattern.permute.xlu0 %v258_v0  ;;  %197 = vmatprep.subr.bf16.mxu0 %v259_v1  ;;  %vm199_vm2 = vmpackc.low %vm70_vm0, %vm260_vm1  ;;  %v55_v2 = vld [vmem:[%s320_s0] sm:$0xff]  ;;  %v65_v4 = vld [vmem:[%s322_s2 + $0x8] sm:$0x3]  ;;  %vm261_vm3 = vmmov 0   ;;  %v262_v6 = vmov 0.0   ;;  %v56_v7 = vlaneseq  ;;  %vm66_vm4 = vcmask 80896  }
  0x14   :  { %v64_v3 = vld [vmem:[%s322_s2] sm:$0xff]  ;;  %59 = vperm.xlu0 %208, %v55_v2   ;;  %194 = vmatprep.mubr.msk.f32.mxu0 %vm261_vm3, %v262_v6  ;;  %vm52_vm6 = vcmask 253952   ;;  %vm147_vm7 = vcmask 261120   ;;  %s263_s0 = smov [#allocation6]  }
  0x15   :  { %v198_v5 = vpack.c.bf16 %v65_v4, %v64_v3  ;;  %v57_v8 = vand.u32 127, %v56_v7  ;;  %53 = vst.msk [vmem:[#allocation2] sm:$0x1] %vm52_vm6, %v262_v6  ;;  %v54_v11 = vld [vmem:[#allocation3] sm:$0xff]  ;;  %s169_s1 = sshll.u32 %s263_s0, 4  ;;  %s170_s1 = int_to_ptr.vmem [resolvable:$true] %s169_s1 }
  0x16   :  { %s231_s2 = scalar_lea.vmem %s170_s1, 16  ;;  %s235_s30 = scalar_lea.vmem %s170_s1, 32 }
  0x17   :  { %200 = vmatpush3.bf16.msk.msra.mxu0 %vm199_vm2, %v198_v5  ;;  %p232_p8 = scmp.ne.s32.totalorder %s170_s1, %s231_s2  ;;  %p236_p9 = scmp.lt.s32.totalorder %s170_s1, %s170_s1 }
  0x18   :  { %p237_p10 = scmp.lt.s32.totalorder %s235_s30, %s231_s2 }
  0x1a   :  { %p238_p11 = por %p237_p10, %p236_p9 }
  0x1c   :  { %v146_v22 = vld [vmem:[#allocation2] sm:$0x1]  ;;  %p239_p12 = pnand %p238_p11, %p232_p8 }
  0x93   :  { %v60_v9 = vpop.permute.xlu0 %59 }
  0x94   :  { %vm61_vm5 = vcmp.eq.s32.totalorder %v60_v9, %v57_v8 }
  0x95   :  { %v184_v10 = vsel %vm61_vm5, 1.0, %v262_v6 }
  0x96   :  { %195 = vmatmul.mubr.msk.f32.vlgmr.msra.gmra.mrb[0].mxu0 %vm66_vm4, %v184_v10 }
 0x169   :  { %v140_v12 = vpop.f32.mrb[0].mxu0 }
 0x16a   :  { %v144_v13 = vsub.f32 %v54_v11, %v140_v12  ;;  %v196_v14 = vpop.f32.mrb[1].mxu0 }
 0x16c   :  { %v145_v15 = vmul.f32 %v144_v13, %v144_v13 }
 0x16e   :  { %v148_v16 = vsel %vm147_vm7, %v145_v15, 0.0 }
 0x16f   :  { %v149_v17 = vrot.slane %v148_v16, 4 }
 0x171   :  { %v150_v18 = vadd.f32 %v149_v17, %v148_v16 }
 0x173   :  { %v151_v19 = vrot.slane %v150_v18, 2 }
 0x175   :  { %v152_v20 = vadd.f32 %v151_v19, %v150_v18 }
 0x177   :  { %v153_v21 = vrot.slane %v152_v20, 1 }
 0x179   :  { %v154_v23 = vadd.f32 %v153_v21, %v152_v20 }
 0x17b   :  { %v155_v24 = vadd.f32 %v154_v23, %v146_v22 }
 0x17d   :  { %157 = vst.msk [vmem:[#allocation2] sm:$0x1] %vm52_vm6, %v155_v24 }
 0x184   :  { %v161_v25 = vld [vmem:[#allocation2] sm:$0x1] }
 0x185   :  { %162 = vst.msk [vmem:[#allocation6] sm:$0x1] %vm52_vm6, %v161_v25 }
 0x186   :  { %242 = shalt.err (!%p239_p12)
}
 0x187   :  { %s243_s6 = scalar_lea.hbm %s323_s3, 16 }
 0x188   :  { %p244_p13 = scmp.ne.s32.totalorder %s323_s3, %s243_s6  ;;  %p247_p0 = scmp.lt.u32.totalorder %s243_s6, %s323_s3 }
 0x18a   :  { %p249_p1 = pnand %p247_p0, %p244_p13 }
 0x18c   :  { %252 = shalt.err (!%p249_p1)
}
 0x18d   :  { %172 = dma.vmem_to_hbm [thread:$0]  %s170_s1, 16, %s323_s3, [#allocation5]  }
 0x18e   :  { %255 = dma.done.wait [#allocation5], 16  }
 0x18f   :  { %256 = vsyncadd [#allocation5], 4294967280 }
 0x190   :  { %176 = vsyncpa [#allocation4], 1 }
 0x191   :  { %177 = vsyncpa [#allocation5], 1 }

</bundles_post_ra>
